<compile_context>
chip_gen: v7x
topology: tpu7x:2x2x1
jax: 0.10.0
libtpu: 0.0.40
codegen_flags: <defaults>
</compile_context>

<pallas_src>
import math

import jax
import jax.numpy as jnp
from jax.experimental import pallas as pl
from jax.experimental.pallas import tpu as pltpu

D_IN, D_H, D_OUT = 20, 100, 50

# Largest batch tile (multiple of 8). With f32 I/O tiles lane-padded to 128,
# per-step VMEM is ~2.5 KiB/row (2 x-bufs + 2 out-bufs + hidden) -> ~5 MiB at
# TB=2048, comfortably inside every generation's scoped-VMEM budget.
_TB_MAX = 2048
_VMEM_LIMIT_BYTES = 32 * 1024 * 1024


def _gmm_encoder_kernel(x_ref, w1_ref, b1_ref, w2_ref, b2_ref, o_ref):
    """Fused 2-layer MLP on one batch tile: ReLU(ReLU(x@W1+b1)@W2+b2).

    bf16 MXU operands, f32 accumulation (preferred_element_type), f32
    elementwise bias/ReLU.
    """
    x = x_ref[...].astype(jnp.bfloat16)    # (TB, 20)
    w1 = w1_ref[...].astype(jnp.bfloat16)  # (20, 100)
    w2 = w2_ref[...].astype(jnp.bfloat16)  # (100, 50)
    b1 = b1_ref[...].astype(jnp.float32)   # (1, 100) broadcasts over rows
    b2 = b2_ref[...].astype(jnp.float32)   # (1, 50)

    h = jnp.dot(x, w1, preferred_element_type=jnp.float32) + b1
    h = jnp.maximum(h, 0.0)                # ReLU (VPU, f32)
    y = jnp.dot(h.astype(jnp.bfloat16), w2, preferred_element_type=jnp.float32) + b2
    y = jnp.maximum(y, 0.0)                # ReLU (VPU, f32)

    o_ref[...] = y.astype(o_ref.dtype)


def _gmm_encoder_call(x, w1, b1_2d, w2, b2_2d):
    B, d_in = x.shape
    d_h = w1.shape[1]
    d_out = w2.shape[1]

    # Batch tile: full-array block for small B (legal for any B), otherwise a
    # multiple-of-8 tile so the (8, 128) sublane rule holds. Tail blocks for
    # B % tb != 0 are masked by Pallas on writeback.
    tb = B if B <= _TB_MAX else _TB_MAX
    grid = (pl.cdiv(B, tb),)

    vmem = pltpu.MemorySpace.VMEM
    cost = pl.CostEstimate(
        flops=2 * B * (d_in * d_h + d_h * d_out),
        transcendentals=0,
        bytes_accessed=(B * (d_in + d_out)
                        + d_in * d_h + d_h + d_h * d_out + d_out) * 4,
    )

    return pl.pallas_call(
        _gmm_encoder_kernel,
        out_shape=jax.ShapeDtypeStruct((B, d_out), x.dtype),
        grid=grid,
        in_specs=[
            # x: streamed per batch tile (auto double-buffered by Pallas).
            pl.BlockSpec((tb, d_in), lambda i: (i, 0), memory_space=vmem),
            # Weights / biases: constant index_map -> fetched once, VMEM-resident.
            pl.BlockSpec((d_in, d_h), lambda i: (0, 0), memory_space=vmem),
            pl.BlockSpec((1, d_h), lambda i: (0, 0), memory_space=vmem),
            pl.BlockSpec((d_h, d_out), lambda i: (0, 0), memory_space=vmem),
            pl.BlockSpec((1, d_out), lambda i: (0, 0), memory_space=vmem),
        ],
        out_specs=pl.BlockSpec((tb, d_out), lambda i: (i, 0), memory_space=vmem),
        compiler_params=pltpu.CompilerParams(
            # Batch tiles are independent -> shard the grid across v7x's 2 TCs.
            dimension_semantics=("parallel",),
            vmem_limit_bytes=_VMEM_LIMIT_BYTES,
        ),
        cost_estimate=cost,
    )(x, w1, b1_2d, w2, b2_2d)


@jax.jit
def gmm_encoder_forward(x, w1, b1, w2, b2):
    """Equivalent of GMM_Encoder.forward(x).

    Weights use (in_features, out_features) layout; a PyTorch nn.Linear
    weight of shape (out, in) corresponds to its transpose here.
    """
    b1_2d = b1.reshape(1, -1)  # present biases as lane-major rows
    b2_2d = b2.reshape(1, -1)
    return _gmm_encoder_call(x, w1, b1_2d, w2, b2_2d)


class GMMEncoderPallas:
    """Mirrors the PyTorch GMM_Encoder module (parameters + fused forward)."""

    def __init__(self, key: jax.Array, d_in: int = D_IN, d_h: int = D_H, d_out: int = D_OUT):
        k_w1, k_b1, k_w2, k_b2 = jax.random.split(key, 4)
        # PyTorch nn.Linear default init: U(-1/sqrt(fan_in), +1/sqrt(fan_in)).
        lim1 = 1.0 / math.sqrt(d_in)
        lim2 = 1.0 / math.sqrt(d_h)
        self.w1 = jax.random.uniform(k_w1, (d_in, d_h), jnp.float32, -lim1, lim1)
        self.b1 = jax.random.uniform(k_b1, (d_h,), jnp.float32, -lim1, lim1)
        self.w2 = jax.random.uniform(k_w2, (d_h, d_out), jnp.float32, -lim2, lim2)
        self.b2 = jax.random.uniform(k_b2, (d_out,), jnp.float32, -lim2, lim2)

    def __call__(self, x: jax.Array) -> jax.Array:
        return gmm_encoder_forward(x, self.w1, self.b1, self.w2, self.b2)


if __name__ == "__main__":
    key = jax.random.PRNGKey(0)
    k_params, k_x = jax.random.split(key)

    B = 8  # small correctness-check batch (perf should be validated at large B)
    module = GMMEncoderPallas(k_params)
    x = jax.random.normal(k_x, (B, D_IN), dtype=jnp.float32)

    out = jax.block_until_ready(module(x))

    # Reference with the same bf16-operand / f32-accumulate matmul contract.
    w1b = module.w1.astype(jnp.bfloat16)
    w2b = module.w2.astype(jnp.bfloat16)
    h_ref = jnp.maximum(
        jnp.dot(x.astype(jnp.bfloat16), w1b, preferred_element_type=jnp.float32)
        + module.b1, 0.0)
    ref_bf16 = jnp.maximum(
        jnp.dot(h_ref.astype(jnp.bfloat16), w2b, preferred_element_type=jnp.float32)
        + module.b2, 0.0)
    # Full-f32 reference (PyTorch-equivalent math) with a looser bound, since
    # the kernel intentionally feeds the MXU bf16 operands.
    ref_f32 = jax.nn.relu(jax.nn.relu(x @ module.w1 + module.b1) @ module.w2 + module.b2)

    assert out.shape == (B, D_OUT), out.shape
    assert jnp.allclose(out, ref_bf16, atol=1e-2, rtol=1e-2), \
        float(jnp.max(jnp.abs(out - ref_bf16)))
    assert jnp.allclose(out, ref_f32, atol=5e-2, rtol=5e-2), \
        float(jnp.max(jnp.abs(out - ref_f32)))

    print("KERNEL_OK")
</pallas_src>

<mosaic_0001>
module attributes {stable_mosaic.version = 11 : i64} {
  func.func @_gmm_encoder_kernel(%arg0: i32, %arg1: memref<8x20xf32, #tpu.memory_space<vmem>>, %arg2: memref<20x100xf32, #tpu.memory_space<vmem>>, %arg3: memref<1x100xf32, #tpu.memory_space<vmem>>, %arg4: memref<100x50xf32, #tpu.memory_space<vmem>>, %arg5: memref<1x50xf32, #tpu.memory_space<vmem>>, %arg6: memref<8x50xf32, #tpu.memory_space<vmem>>) attributes {dimension_semantics = [#tpu.dimension_semantics<parallel>], iteration_bounds = array<i64: 1>, scalar_prefetch = 0 : i64, scratch_operands = 0 : i64, tpu.core_type = #tpu.core_type<tc>, window_params = [{transform_indices = @transform_0, window_bounds = array<i64: 8, 20>}, {pipeline_mode = #tpu.pipeline_mode<synchronous>, transform_indices = @transform_1, window_bounds = array<i64: 20, 100>}, {pipeline_mode = #tpu.pipeline_mode<synchronous>, transform_indices = @transform_2, window_bounds = array<i64: 1, 100>}, {pipeline_mode = #tpu.pipeline_mode<synchronous>, transform_indices = @transform_3, window_bounds = array<i64: 100, 50>}, {pipeline_mode = #tpu.pipeline_mode<synchronous>, transform_indices = @transform_4, window_bounds = array<i64: 1, 50>}, {transform_indices = @transform_5, window_bounds = array<i64: 8, 50>}]} {
    %c0 = arith.constant 0 : index
    %c0_0 = arith.constant 0 : index
    %0 = vector.load %arg1[%c0, %c0_0] : memref<8x20xf32, #tpu.memory_space<vmem>>, vector<8x20xf32>
    %1 = arith.truncf %0 : vector<8x20xf32> to vector<8x20xbf16>
    %c0_1 = arith.constant 0 : index
    %c0_2 = arith.constant 0 : index
    %2 = vector.load %arg2[%c0_1, %c0_2] : memref<20x100xf32, #tpu.memory_space<vmem>>, vector<20x100xf32>
    %3 = arith.truncf %2 : vector<20x100xf32> to vector<20x100xbf16>
    %c0_3 = arith.constant 0 : index
    %c0_4 = arith.constant 0 : index
    %4 = vector.load %arg4[%c0_3, %c0_4] : memref<100x50xf32, #tpu.memory_space<vmem>>, vector<100x50xf32>
    %5 = arith.truncf %4 : vector<100x50xf32> to vector<100x50xbf16>
    %c0_5 = arith.constant 0 : index
    %c0_6 = arith.constant 0 : index
    %6 = vector.load %arg3[%c0_5, %c0_6] : memref<1x100xf32, #tpu.memory_space<vmem>>, vector<1x100xf32>
    %c0_7 = arith.constant 0 : index
    %c0_8 = arith.constant 0 : index
    %7 = vector.load %arg5[%c0_7, %c0_8] : memref<1x50xf32, #tpu.memory_space<vmem>>, vector<1x50xf32>
    %cst = arith.constant dense<0.000000e+00> : vector<8x100xf32>
    %8 = tpu.matmul %1, %3, %cst {dimension_numbers = #tpu.dot_dimension_numbers<[1], [0], [0], [1], [0, 0, 1, 1], [], []>} : vector<8x20xbf16>, vector<20x100xbf16>, vector<8x100xf32> -> vector<8x100xf32>
    %9 = vector.broadcast %6 : vector<1x100xf32> to vector<8x100xf32>
    %10 = arith.addf %8, %9 : vector<8x100xf32>
    %cst_9 = arith.constant 0.000000e+00 : f32
    %11 = vector.broadcast %cst_9 : f32 to vector<8x100xf32>
    %12 = arith.maximumf %10, %11 : vector<8x100xf32>
    %13 = arith.truncf %12 : vector<8x100xf32> to vector<8x100xbf16>
    %cst_10 = arith.constant dense<0.000000e+00> : vector<8x50xf32>
    %14 = tpu.matmul %13, %5, %cst_10 {dimension_numbers = #tpu.dot_dimension_numbers<[1], [0], [0], [1], [0, 0, 1, 1], [], []>} : vector<8x100xbf16>, vector<100x50xbf16>, vector<8x50xf32> -> vector<8x50xf32>
    %15 = vector.broadcast %7 : vector<1x50xf32> to vector<8x50xf32>
    %16 = arith.addf %14, %15 : vector<8x50xf32>
    %cst_11 = arith.constant 0.000000e+00 : f32
    %17 = vector.broadcast %cst_11 : f32 to vector<8x50xf32>
    %18 = arith.maximumf %16, %17 : vector<8x50xf32>
    %c0_12 = arith.constant 0 : index
    %c0_13 = arith.constant 0 : index
    %19 = vector.load %arg6[%c0_12, %c0_13] : memref<8x50xf32, #tpu.memory_space<vmem>>, vector<8x50xf32>
    tpu.vector_store %arg6[%c0_12, %c0_13], %18 {strides = array<i32>} : memref<8x50xf32, #tpu.memory_space<vmem>>, vector<8x50xf32>,
    return
  }
  func.func @transform_0(%arg0: i32) -> (i32, i32) {
    %c0_i32 = arith.constant 0 : i32
    %c0_i32_0 = arith.constant 0 : i32
    return %arg0, %c0_i32 : i32, i32
  }
  func.func @transform_1(%arg0: i32) -> (i32, i32) {
    %c0_i32 = arith.constant 0 : i32
    %c0_i32_0 = arith.constant 0 : i32
    %c0_i32_1 = arith.constant 0 : i32
    return %c0_i32, %c0_i32_0 : i32, i32
  }
  func.func @transform_2(%arg0: i32) -> (i32, i32) {
    %c0_i32 = arith.constant 0 : i32
    %c0_i32_0 = arith.constant 0 : i32
    %c0_i32_1 = arith.constant 0 : i32
    return %c0_i32, %c0_i32_0 : i32, i32
  }
  func.func @transform_3(%arg0: i32) -> (i32, i32) {
    %c0_i32 = arith.constant 0 : i32
    %c0_i32_0 = arith.constant 0 : i32
    %c0_i32_1 = arith.constant 0 : i32
    return %c0_i32, %c0_i32_0 : i32, i32
  }
  func.func @transform_4(%arg0: i32) -> (i32, i32) {
    %c0_i32 = arith.constant 0 : i32
    %c0_i32_0 = arith.constant 0 : i32
    %c0_i32_1 = arith.constant 0 : i32
    return %c0_i32, %c0_i32_0 : i32, i32
  }
  func.func @transform_5(%arg0: i32) -> (i32, i32) {
    %c0_i32 = arith.constant 0 : i32
    %c0_i32_0 = arith.constant 0 : i32
    return %arg0, %c0_i32 : i32, i32
  }
}

</mosaic_0001>

<bundles_post_ra>
// kernel: gmm_encoder_forward.1
= control target key start
LH: loop header
LB: loop body
LE: loop exit
PB: predicated region body
PF: predicated region fallthrough
CT: control target
= control target key end

     0   :  { %v245_v3 = vmov 0.0   ;;  %vm61_vm0 = vcmask 1041408   ;;  %vm246_vm1 = vmmov 0   ;;  %s349_s0 = inlined_call_operand.vmem [shape: f32[8,20], index: 0, kind: input, shape index: {}]   ;;  %s350_s1 = inlined_call_operand.vmem [shape: f32[20,100], index: 1, kind: input, shape index: {}]   ;;  %s351_s2 = inlined_call_operand.vmem [shape: f32[1,100], index: 2, kind: input, shape index: {}]   ;;  %s352_s3 = inlined_call_operand.vmem [shape: f32[100,50], index: 3, kind: input, shape index: {}]   ;;  %s353_s4 = inlined_call_operand.vmem [shape: f32[1,50], index: 4, kind: input, shape index: {}]   ;;  %s354_s5 = inlined_call_operand.hbm [shape: f32[8,50], index: 5, kind: output, shape index: {}]  }
   0x1   :  { %v24_v0 = vld [vmem:[%s350_s1] sm:$0xff]  ;;  %v25_v1 = vld [vmem:[%s350_s1 + $0x8] sm:$0xff]  ;;  %v26_v2 = vld [vmem:[%s350_s1 + $0x10] sm:$0xf]  ;;  %192 = vmatprep.subr.bf16.mxu0 %v245_v3  ;;  %200 = vmatprep.subr.bf16.mxu1 %v245_v3 }
   0x2   :  { %v27_v4 = vpack.c.bf16 %v25_v1, %v24_v0  ;;  %v28_v5 = vpack.c.bf16 %v26_v2, %v26_v2  ;;  %v29_v6 = vld [vmem:[%s352_s3] sm:$0xff]  ;;  %v30_v7 = vld [vmem:[%s352_s3 + $0x8] sm:$0xff]  ;;  %196 = vmatprep.mubr.msk.bf16.mxu0 %vm246_vm1, %v245_v3  ;;  %v31_v9 = vld [vmem:[%s352_s3 + $0x10] sm:$0xff]  ;;  %214 = vmatprep.mubr.msk.bf16.mxu1 %vm246_vm1, %v245_v3 }
   0x3   :  { %v42_v8 = vpack.c.bf16 %v30_v7, %v29_v6  ;;  %v32_v10 = vld [vmem:[%s352_s3 + $0x18] sm:$0xff]  ;;  %v22_v11 = vld [vmem:[%s349_s0] sm:$0xff]  ;;  %v34_v15 = vld [vmem:[%s352_s3 + $0x28] sm:$0xff] }
   0x4   :  { %193 = vmatpush3.bf16.msra.mxu0 %v27_v4  ;;  %v63_v12 = vsel %vm61_vm0, %v28_v5, 0  ;;  %v43_v13 = vpack.c.bf16 %v32_v10, %v31_v9  ;;  %v33_v14 = vld [vmem:[%s352_s3 + $0x20] sm:$0xff] }
   0x5   :  { %194 = vmatprep.subr.bf16.mxu0 %v245_v3  ;;  %201 = vmatpush3.bf16.msra.mxu1 %v42_v8 }
   0x6   :  { %202 = vmatprep.subr.bf16.mxu1 %v245_v3 }
   0x7   :  { %10 = vsyncpa [#allocation3], 0  ;;  %v23_v16 = vpack.c.bf16 %v22_v11, %v22_v11  ;;  %vm57_vm2 = vcmask 162816   ;;  %v44_v17 = vpack.c.bf16 %v34_v15, %v33_v14  ;;  %v35_v18 = vld [vmem:[%s352_s3 + $0x30] sm:$0xff]  ;;  %v36_v19 = vld [vmem:[%s352_s3 + $0x38] sm:$0xff]  ;;  %vm113_vm3 = vcmask 818176  }
   0x8   :  { %195 = vmatpush3.bf16.msra.mxu0 %v63_v12  ;;  %v45_v20 = vpack.c.bf16 %v36_v19, %v35_v18  ;;  %v37_v21 = vld [vmem:[%s352_s3 + $0x40] sm:$0xff]  ;;  %v38_v22 = vld [vmem:[%s352_s3 + $0x48] sm:$0xff]  ;;  %v39_v24 = vld [vmem:[%s352_s3 + $0x50] sm:$0xff]  ;;  %s247_s28 = smov [#allocation2]   ;;  %vm161_vm4 = vcmask 408576  }
   0x9   :  { %203 = vmatpush3.bf16.msra.mxu1 %v43_v13  ;;  %v46_v23 = vpack.c.bf16 %v38_v22, %v37_v21  ;;  %v40_v25 = vld [vmem:[%s352_s3 + $0x58] sm:$0xff]  ;;  %v41_v27 = vld [vmem:[%s352_s3 + $0x60] sm:$0xf]  ;;  %s169_s29 = sshll.u32 %s247_s28, 4  ;;  %s170_s29 = int_to_ptr.vmem [resolvable:$true] %s169_s29 }
   0xa   :  { %204 = vmatprep.subr.bf16.mxu1 %v245_v3  ;;  %v47_v26 = vpack.c.bf16 %v40_v25, %v39_v24  ;;  %v48_v28 = vpack.c.bf16 %v41_v27, %v41_v27  ;;  %v177_v30 = vld [vmem:[%s351_s2] ss:$0 sm:$0xff]  ;;  %s221_s2 = scalar_lea.vmem %s170_s29, 128  ;;  %p226_p1 = scmp.lt.s32.totalorder %s170_s29, %s170_s29 }
   0xb   :  { %197 = vmatmul.mubr.msk.bf16.vlgmr.msra.gmra.mrb[0].mxu0 %vm57_vm2, %v23_v16  ;;  %v179_v38 = vld [vmem:[%s353_s4] ss:$0 sm:$0xff]  ;;  %p222_p0 = scmp.ne.s32.totalorder %s170_s29, %s221_s2  ;;  %p227_p2 = scmp.lt.s32.totalorder %s221_s2, %s221_s2 }
   0xc   :  { %v118_v29 = vsel %vm61_vm0, %v48_v28, 0 }
   0xd   :  { %205 = vmatpush3.bf16.msra.mxu1 %v44_v17  ;;  %p228_p3 = por %p227_p2, %p226_p1 }
   0xe   :  { %206 = vmatprep.subr.bf16.mxu1 %v245_v3 }
   0xf   :  { %p229_p4 = pnand %p228_p3, %p222_p0 }
  0x11   :  { %207 = vmatpush3.bf16.msra.mxu1 %v45_v20 }
  0x12   :  { %208 = vmatprep.subr.bf16.mxu1 %v245_v3 }
  0x15   :  { %209 = vmatpush3.bf16.msra.mxu1 %v46_v23 }
  0x16   :  { %210 = vmatprep.subr.bf16.mxu1 %v245_v3 }
  0x19   :  { %211 = vmatpush3.bf16.msra.mxu1 %v47_v26 }
  0x1a   :  { %212 = vmatprep.subr.bf16.mxu1 %v245_v3 }
  0x1d   :  { %213 = vmatpush3.bf16.msra.mxu1 %v118_v29 }
  0xde   :  { %v99_v31 = vpop.f32.mrb[0].mxu0 }
  0xdf   :  { %v100_v32 = vadd.f32 %v177_v30, %v99_v31  ;;  %v198_v33 = vpop.f32.mrb[1].mxu0 }
  0xe0   :  { %v102_v34 = vpop.f32.mrb[2].mxu0 }
  0xe1   :  { %v105_v35 = vmax.f32 %v100_v32, 0.0  ;;  %v199_v36 = vpop.f32.mrb[3].mxu0 }
  0xe3   :  { %v106_v37 = vpack.c.bf16 %v105_v35, %v105_v35 }
  0xe5   :  { %215 = vmatmul.mubr.msk.bf16.vlgmr.msra.gmra.mrb[0].mxu1 %vm113_vm3, %v106_v37 }
 0x1b8   :  { %v154_v39 = vpop.f32.mrb[0].mxu1 }
 0x1b9   :  { %v155_v40 = vadd.f32 %v179_v38, %v154_v39  ;;  %v216_v41 = vpop.f32.mrb[1].mxu1 }
 0x1ba   :  { %v157_v42 = vpop.f32.mrb[2].mxu1 }
 0x1bb   :  { %v160_v43 = vmax.f32 %v155_v40, 0.0  ;;  %v217_v44 = vpop.f32.mrb[3].mxu1 }
 0x1bd   :  { %162 = vst.msk [vmem:[#allocation2] sm:$0xff] %vm161_vm4, %v160_v43 }
 0x1be   :  { %232 = shalt.err (!%p229_p4)
}
 0x1bf   :  { %s233_s30 = scalar_lea.hbm %s354_s5, 128 }
 0x1c0   :  { %p234_p5 = scmp.ne.s32.totalorder %s354_s5, %s233_s30  ;;  %p237_p6 = scmp.lt.u32.totalorder %s233_s30, %s354_s5 }
 0x1c2   :  { %p239_p7 = pnand %p237_p6, %p234_p5 }
 0x1c4   :  { %242 = shalt.err (!%p239_p7)
}
 0x1c5   :  { %172 = dma.vmem_to_hbm [thread:$0]  %s170_s29, 128, %s354_s5, [#allocation3]  }
 0x1c6   :  { %243 = dma.done.wait [#allocation3], 128  }
 0x1c7   :  { %244 = vsyncadd [#allocation3], 4294967168 }
 0x1c8   :  { %176 = vsyncpa [#allocation3], 1 }

</bundles_post_ra>
